<compile_context>
chip_gen: v6e
topology: v6e:2x2x1
jax: 0.10.0
libtpu: 0.0.40
codegen_flags: <defaults>
</compile_context>

<pallas_src>
import functools

import jax
import jax.numpy as jnp
from jax.experimental import pallas as pl
from jax.experimental.pallas import tpu as pltpu

# ---- hyper-parameters (synthetic, small, consistent with the module) -------
CIRCULAR_INPUT_DIM = 4
GO_INPUT_DIM = 1
TASK_INPUT_DIM = 3
INPUT_DIM = CIRCULAR_INPUT_DIM + GO_INPUT_DIM + TASK_INPUT_DIM  # 8
N = 32                 # recurrent hidden size
OUTPUT_DIM = 2
DT_INV = 10
DT = 1.0 / DT_INV      # 0.1


def _rnn_kernel(dt, x_ref, w_in_ref, w_rec_ref, b_rec_ref, w_out_ref,
                b_out_ref, y_ref, hs_ref):
    """Single-invocation RNN: everything resident in VMEM, time loop unrolled.

    Weights arrive pre-transposed and pre-scaled by dt (see prepare_params),
    so the per-step update is:  h = (1-dt)*h + relu(proj_t + h @ (dt*W_rec^T)).
    """
    B, T, D = x_ref.shape
    n = w_rec_ref.shape[0]
    out_dim = w_out_ref.shape[1]

    # Hoisted loads — read weights/biases once, outside the time loop.
    w_rec = w_rec_ref[...]                      # (N, N)   = dt * W_rec^T
    w_out = w_out_ref[...]                      # (N, OUT) = W_out^T
    b_out = b_out_ref[...]                      # (1, OUT)

    # (1) Input projection for ALL timesteps in one matmul; dt and b_rec are
    #     already folded into w_in / b_rec.  Entirely off the serial path.
    x2 = x_ref[...].reshape(B * T, D)
    proj = (jnp.dot(x2, w_in_ref[...], preferred_element_type=jnp.float32)
            + b_rec_ref[...])                   # (B*T, N) = dt*(x W_in^T + b_rec)
    proj = proj.reshape(B, T, n)                # (B, T, N)
    # NOTE: a time-major (T, B, N) proj would turn the per-step slice below
    # into a leading-axis view, but the slices do not depend on h (they can
    # all be extracted in parallel, off the serial chain), so we skip the
    # extra transpose that time-major layout would require.

    one_minus_dt = 1.0 - dt

    # (2) Sequential leaky-integrator recurrence, fully unrolled.
    #     Only one tiny MXU dot per step remains on the critical path; the
    #     per-step dt multiply has been folded into the weights.
    h = jnp.zeros((B, n), jnp.float32)
    for t in range(T):
        pre = proj[:, t, :] + jnp.dot(h, w_rec,
                                      preferred_element_type=jnp.float32)
        h = one_minus_dt * h + jnp.maximum(pre, 0.0)
        hs_ref[:, t, :] = h                     # cheap masked sublane store

    # (3) Deferred output projection: one batched matmul over all (b, t) rows
    #     read back from the VMEM scratch, and a single store (no per-step
    #     lane-sparse OUT=2 stores, no jnp.stack relayouts).
    H = hs_ref[...].reshape(B * T, n)                           # (B*T, N)
    y = jnp.dot(H, w_out, preferred_element_type=jnp.float32) + b_out
    y_ref[...] = y.reshape(B, T, out_dim).astype(y_ref.dtype)


def prepare_params(w_in, w_rec, b_rec, w_out, b_out, *, dt=DT):
    """One-time weight prep (do NOT call per forward pass).

    PyTorch nn.Linear convention in:
      w_in  : (N, INPUT_DIM)   (no bias)
      w_rec : (N, N), b_rec: (N,)
      w_out : (OUTPUT_DIM, N), b_out: (OUTPUT_DIM,)

    Returns right-multiply-layout weights with dt folded into the
    pre-activation path.  Valid because relu is positively homogeneous and
    dt > 0:  dt*relu(pre) == relu(dt*pre).
    """
    assert dt > 0.0, "dt-folding relies on relu positive homogeneity (dt > 0)"
    n = w_rec.shape[0]
    out_dim = w_out.shape[0]
    w_in_dt = (dt * jnp.transpose(w_in)).astype(jnp.float32)     # (D, N)
    w_rec_dt = (dt * jnp.transpose(w_rec)).astype(jnp.float32)   # (N, N)
    b_rec_dt = (dt * b_rec).reshape(1, n).astype(jnp.float32)    # (1, N)
    w_out_t = jnp.transpose(w_out).astype(jnp.float32)           # (N, OUT)
    b_out_2d = b_out.reshape(1, out_dim).astype(jnp.float32)     # (1, OUT)
    return (w_in_dt, w_rec_dt, b_rec_dt, w_out_t, b_out_2d)


def rnn_forward(X, params, *, dt=DT):
    """X: (B, T, INPUT_DIM) float32 (PyTorch layout).  params: prepare_params(...).

    Returns Y: (B, T, OUTPUT_DIM).  Per call this is a single pallas_call —
    no wrapper-side XLA ops.
    """
    B, T, D = X.shape
    w_in_dt, w_rec_dt, b_rec_dt, w_out_t, b_out_2d = params
    n = w_rec_dt.shape[0]
    out_dim = w_out_t.shape[1]

    if X.dtype != jnp.float32:              # no-op for f32 inputs
        X = X.astype(jnp.float32)

    vmem = pl.BlockSpec(memory_space=pltpu.MemorySpace.VMEM)

    # Single kernel invocation: no grid, whole problem resident in VMEM.
    # The recurrence is inherently sequential; only grow B (toward the MXU
    # height) and, past B>=16, consider a "parallel" batch grid axis for the
    # v7x second TensorCore.
    return pl.pallas_call(
        functools.partial(_rnn_kernel, dt),
        out_shape=jax.ShapeDtypeStruct((B, T, out_dim), jnp.float32),
        in_specs=[vmem, vmem, vmem, vmem, vmem, vmem],
        out_specs=vmem,
        scratch_shapes=[pltpu.VMEM((B, T, n), jnp.float32)],
    )(X, w_in_dt, w_rec_dt, b_rec_dt, w_out_t, b_out_2d)


def _reference_forward(X, w_in, w_rec, b_rec, w_out, b_out, *, dt=DT):
    """Pure-JAX reference mirroring the PyTorch loop (unfolded dt), for checks."""
    B, T, _ = X.shape
    h = jnp.zeros((B, w_rec.shape[0]), jnp.float32)
    ys = []
    for t in range(T):
        x = X[:, t, :]
        pre = x @ w_in.T + h @ w_rec.T + b_rec
        h = (1.0 - dt) * h + dt * jnp.maximum(pre, 0.0)
        ys.append(h @ w_out.T + b_out)
    return jnp.stack(ys, axis=1)


if __name__ == "__main__":
    B, T = 2, 8

    key = jax.random.PRNGKey(0)
    k_x, k_win, k_wrec, k_brec, k_wout, k_bout = jax.random.split(key, 6)

    X = jax.random.normal(k_x, (B, T, INPUT_DIM), dtype=jnp.float32)
    # Deterministic synthetic parameters (nn.Linear-style shapes).
    w_in = jax.random.normal(k_win, (N, INPUT_DIM), dtype=jnp.float32) * 0.2
    w_rec = jax.random.normal(k_wrec, (N, N), dtype=jnp.float32) * 0.1
    b_rec = jax.random.normal(k_brec, (N,), dtype=jnp.float32) * 0.05
    w_out = jax.random.normal(k_wout, (OUTPUT_DIM, N), dtype=jnp.float32) * 0.2
    b_out = jax.random.normal(k_bout, (OUTPUT_DIM,), dtype=jnp.float32) * 0.05

    # One-time weight prep (transpose + dt folding), then a single-call forward.
    params = prepare_params(w_in, w_rec, b_rec, w_out, b_out)
    Y = rnn_forward(X, params)
    Y = jax.block_until_ready(Y)

    Y_ref = _reference_forward(X, w_in, w_rec, b_rec, w_out, b_out)
    assert Y.shape == (B, T, OUTPUT_DIM)
    assert jnp.allclose(Y, Y_ref, atol=1e-5, rtol=1e-5), "mismatch vs reference"

    print("KERNEL_OK")
</pallas_src>

<mosaic_0001>
module attributes {stable_mosaic.version = 11 : i64} {
  func.func @_rnn_kernel(%arg0: memref<2x8x8xf32, #tpu.memory_space<vmem>>, %arg1: memref<8x32xf32, #tpu.memory_space<vmem>>, %arg2: memref<32x32xf32, #tpu.memory_space<vmem>>, %arg3: memref<1x32xf32, #tpu.memory_space<vmem>>, %arg4: memref<32x2xf32, #tpu.memory_space<vmem>>, %arg5: memref<1x2xf32, #tpu.memory_space<vmem>>, %arg6: memref<2x8x2xf32, #tpu.memory_space<vmem>>, %arg7: memref<2x8x32xf32, #tpu.memory_space<vmem>>) attributes {dimension_semantics = [], scalar_prefetch = 0 : i64, scratch_operands = 1 : i64, tpu.core_type = #tpu.core_type<tc>} {
    %c0 = arith.constant 0 : index
    %c0_0 = arith.constant 0 : index
    %0 = vector.load %arg2[%c0, %c0_0] : memref<32x32xf32, #tpu.memory_space<vmem>>, vector<32x32xf32>
    %c0_1 = arith.constant 0 : index
    %c0_2 = arith.constant 0 : index
    %1 = vector.load %arg4[%c0_1, %c0_2] : memref<32x2xf32, #tpu.memory_space<vmem>>, vector<32x2xf32>
    %c0_3 = arith.constant 0 : index
    %c0_4 = arith.constant 0 : index
    %2 = vector.load %arg5[%c0_3, %c0_4] : memref<1x2xf32, #tpu.memory_space<vmem>>, vector<1x2xf32>
    %c0_5 = arith.constant 0 : index
    %c0_6 = arith.constant 0 : index
    %c0_7 = arith.constant 0 : index
    %3 = vector.load %arg0[%c0_5, %c0_6, %c0_7] : memref<2x8x8xf32, #tpu.memory_space<vmem>>, vector<2x8x8xf32>
    %4 = vector.shape_cast %3 : vector<2x8x8xf32> to vector<16x8xf32>
    %c0_8 = arith.constant 0 : index
    %c0_9 = arith.constant 0 : index
    %5 = vector.load %arg1[%c0_8, %c0_9] : memref<8x32xf32, #tpu.memory_space<vmem>>, vector<8x32xf32>
    %cst = arith.constant dense<0.000000e+00> : vector<16x32xf32>
    %6 = tpu.matmul %4, %5, %cst {dimension_numbers = #tpu.dot_dimension_numbers<[1], [0], [0], [1], [0, 0, 1, 1], [], []>} : vector<16x8xf32>, vector<8x32xf32>, vector<16x32xf32> -> vector<16x32xf32>
    %c0_10 = arith.constant 0 : index
    %c0_11 = arith.constant 0 : index
    %7 = vector.load %arg3[%c0_10, %c0_11] : memref<1x32xf32, #tpu.memory_space<vmem>>, vector<1x32xf32>
    %8 = vector.broadcast %7 : vector<1x32xf32> to vector<16x32xf32>
    %9 = arith.addf %6, %8 : vector<16x32xf32>
    %10 = vector.shape_cast %9 : vector<16x32xf32> to vector<2x8x32xf32>
    %cst_12 = arith.constant 0.000000e+00 : f32
    %11 = vector.broadcast %cst_12 : f32 to vector<2x32xf32>
    %12 = vector.extract_strided_slice %10 {offsets = [0, 0, 0], sizes = [2, 1, 32], strides = [1, 1, 1]} : vector<2x8x32xf32> to vector<2x1x32xf32>
    %13 = vector.shape_cast %12 : vector<2x1x32xf32> to vector<2x32xf32>
    %cst_13 = arith.constant dense<0.000000e+00> : vector<2x32xf32>
    %14 = tpu.matmul %11, %0, %cst_13 {dimension_numbers = #tpu.dot_dimension_numbers<[1], [0], [0], [1], [0, 0, 1, 1], [], []>} : vector<2x32xf32>, vector<32x32xf32>, vector<2x32xf32> -> vector<2x32xf32>
    %15 = arith.addf %13, %14 : vector<2x32xf32>
    %cst_14 = arith.constant 0.899999976 : f32
    %16 = vector.broadcast %cst_14 : f32 to vector<2x32xf32>
    %17 = arith.mulf %16, %11 : vector<2x32xf32>
    %cst_15 = arith.constant 0.000000e+00 : f32
    %18 = vector.broadcast %cst_15 : f32 to vector<2x32xf32>
    %19 = arith.maximumf %15, %18 : vector<2x32xf32>
    %20 = arith.addf %17, %19 : vector<2x32xf32>
    %c0_16 = arith.constant 0 : index
    %c0_17 = arith.constant 0 : index
    %c0_18 = arith.constant 0 : index
    %21 = vector.load %arg7[%c0_16, %c0_17, %c0_18] : memref<2x8x32xf32, #tpu.memory_space<vmem>>, vector<2x1x32xf32>
    %22 = vector.shape_cast %21 : vector<2x1x32xf32> to vector<2x32xf32>
    %23 = vector.shape_cast %20 : vector<2x32xf32> to vector<2x1x32xf32>
    tpu.vector_store %arg7[%c0_16, %c0_17, %c0_18], %23 {strides = array<i32>} : memref<2x8x32xf32, #tpu.memory_space<vmem>>, vector<2x1x32xf32>,
    %24 = vector.extract_strided_slice %10 {offsets = [0, 1, 0], sizes = [2, 1, 32], strides = [1, 1, 1]} : vector<2x8x32xf32> to vector<2x1x32xf32>
    %25 = vector.shape_cast %24 : vector<2x1x32xf32> to vector<2x32xf32>
    %cst_19 = arith.constant dense<0.000000e+00> : vector<2x32xf32>
    %26 = tpu.matmul %20, %0, %cst_19 {dimension_numbers = #tpu.dot_dimension_numbers<[1], [0], [0], [1], [0, 0, 1, 1], [], []>} : vector<2x32xf32>, vector<32x32xf32>, vector<2x32xf32> -> vector<2x32xf32>
    %27 = arith.addf %25, %26 : vector<2x32xf32>
    %cst_20 = arith.constant 0.899999976 : f32
    %28 = vector.broadcast %cst_20 : f32 to vector<2x32xf32>
    %29 = arith.mulf %28, %20 : vector<2x32xf32>
    %cst_21 = arith.constant 0.000000e+00 : f32
    %30 = vector.broadcast %cst_21 : f32 to vector<2x32xf32>
    %31 = arith.maximumf %27, %30 : vector<2x32xf32>
    %32 = arith.addf %29, %31 : vector<2x32xf32>
    %c0_22 = arith.constant 0 : index
    %c1 = arith.constant 1 : index
    %c0_23 = arith.constant 0 : index
    %33 = vector.load %arg7[%c0_22, %c1, %c0_23] : memref<2x8x32xf32, #tpu.memory_space<vmem>>, vector<2x1x32xf32>
    %34 = vector.shape_cast %33 : vector<2x1x32xf32> to vector<2x32xf32>
    %35 = vector.shape_cast %32 : vector<2x32xf32> to vector<2x1x32xf32>
    tpu.vector_store %arg7[%c0_22, %c1, %c0_23], %35 {strides = array<i32>} : memref<2x8x32xf32, #tpu.memory_space<vmem>>, vector<2x1x32xf32>,
    %36 = vector.extract_strided_slice %10 {offsets = [0, 2, 0], sizes = [2, 1, 32], strides = [1, 1, 1]} : vector<2x8x32xf32> to vector<2x1x32xf32>
    %37 = vector.shape_cast %36 : vector<2x1x32xf32> to vector<2x32xf32>
    %cst_24 = arith.constant dense<0.000000e+00> : vector<2x32xf32>
    %38 = tpu.matmul %32, %0, %cst_24 {dimension_numbers = #tpu.dot_dimension_numbers<[1], [0], [0], [1], [0, 0, 1, 1], [], []>} : vector<2x32xf32>, vector<32x32xf32>, vector<2x32xf32> -> vector<2x32xf32>
    %39 = arith.addf %37, %38 : vector<2x32xf32>
    %cst_25 = arith.constant 0.899999976 : f32
    %40 = vector.broadcast %cst_25 : f32 to vector<2x32xf32>
    %41 = arith.mulf %40, %32 : vector<2x32xf32>
    %cst_26 = arith.constant 0.000000e+00 : f32
    %42 = vector.broadcast %cst_26 : f32 to vector<2x32xf32>
    %43 = arith.maximumf %39, %42 : vector<2x32xf32>
    %44 = arith.addf %41, %43 : vector<2x32xf32>
    %c0_27 = arith.constant 0 : index
    %c2 = arith.constant 2 : index
    %c0_28 = arith.constant 0 : index
    %45 = vector.load %arg7[%c0_27, %c2, %c0_28] : memref<2x8x32xf32, #tpu.memory_space<vmem>>, vector<2x1x32xf32>
    %46 = vector.shape_cast %45 : vector<2x1x32xf32> to vector<2x32xf32>
    %47 = vector.shape_cast %44 : vector<2x32xf32> to vector<2x1x32xf32>
    tpu.vector_store %arg7[%c0_27, %c2, %c0_28], %47 {strides = array<i32>} : memref<2x8x32xf32, #tpu.memory_space<vmem>>, vector<2x1x32xf32>,
    %48 = vector.extract_strided_slice %10 {offsets = [0, 3, 0], sizes = [2, 1, 32], strides = [1, 1, 1]} : vector<2x8x32xf32> to vector<2x1x32xf32>
    %49 = vector.shape_cast %48 : vector<2x1x32xf32> to vector<2x32xf32>
    %cst_29 = arith.constant dense<0.000000e+00> : vector<2x32xf32>
    %50 = tpu.matmul %44, %0, %cst_29 {dimension_numbers = #tpu.dot_dimension_numbers<[1], [0], [0], [1], [0, 0, 1, 1], [], []>} : vector<2x32xf32>, vector<32x32xf32>, vector<2x32xf32> -> vector<2x32xf32>
    %51 = arith.addf %49, %50 : vector<2x32xf32>
    %cst_30 = arith.constant 0.899999976 : f32
    %52 = vector.broadcast %cst_30 : f32 to vector<2x32xf32>
    %53 = arith.mulf %52, %44 : vector<2x32xf32>
    %cst_31 = arith.constant 0.000000e+00 : f32
    %54 = vector.broadcast %cst_31 : f32 to vector<2x32xf32>
    %55 = arith.maximumf %51, %54 : vector<2x32xf32>
    %56 = arith.addf %53, %55 : vector<2x32xf32>
    %c0_32 = arith.constant 0 : index
    %c3 = arith.constant 3 : index
    %c0_33 = arith.constant 0 : index
    %57 = vector.load %arg7[%c0_32, %c3, %c0_33] : memref<2x8x32xf32, #tpu.memory_space<vmem>>, vector<2x1x32xf32>
    %58 = vector.shape_cast %57 : vector<2x1x32xf32> to vector<2x32xf32>
    %59 = vector.shape_cast %56 : vector<2x32xf32> to vector<2x1x32xf32>
    tpu.vector_store %arg7[%c0_32, %c3, %c0_33], %59 {strides = array<i32>} : memref<2x8x32xf32, #tpu.memory_space<vmem>>, vector<2x1x32xf32>,
    %60 = vector.extract_strided_slice %10 {offsets = [0, 4, 0], sizes = [2, 1, 32], strides = [1, 1, 1]} : vector<2x8x32xf32> to vector<2x1x32xf32>
    %61 = vector.shape_cast %60 : vector<2x1x32xf32> to vector<2x32xf32>
    %cst_34 = arith.constant dense<0.000000e+00> : vector<2x32xf32>
    %62 = tpu.matmul %56, %0, %cst_34 {dimension_numbers = #tpu.dot_dimension_numbers<[1], [0], [0], [1], [0, 0, 1, 1], [], []>} : vector<2x32xf32>, vector<32x32xf32>, vector<2x32xf32> -> vector<2x32xf32>
    %63 = arith.addf %61, %62 : vector<2x32xf32>
    %cst_35 = arith.constant 0.899999976 : f32
    %64 = vector.broadcast %cst_35 : f32 to vector<2x32xf32>
    %65 = arith.mulf %64, %56 : vector<2x32xf32>
    %cst_36 = arith.constant 0.000000e+00 : f32
    %66 = vector.broadcast %cst_36 : f32 to vector<2x32xf32>
    %67 = arith.maximumf %63, %66 : vector<2x32xf32>
    %68 = arith.addf %65, %67 : vector<2x32xf32>
    %c0_37 = arith.constant 0 : index
    %c4 = arith.constant 4 : index
    %c0_38 = arith.constant 0 : index
    %69 = vector.load %arg7[%c0_37, %c4, %c0_38] : memref<2x8x32xf32, #tpu.memory_space<vmem>>, vector<2x1x32xf32>
    %70 = vector.shape_cast %69 : vector<2x1x32xf32> to vector<2x32xf32>
    %71 = vector.shape_cast %68 : vector<2x32xf32> to vector<2x1x32xf32>
    tpu.vector_store %arg7[%c0_37, %c4, %c0_38], %71 {strides = array<i32>} : memref<2x8x32xf32, #tpu.memory_space<vmem>>, vector<2x1x32xf32>,
    %72 = vector.extract_strided_slice %10 {offsets = [0, 5, 0], sizes = [2, 1, 32], strides = [1, 1, 1]} : vector<2x8x32xf32> to vector<2x1x32xf32>
    %73 = vector.shape_cast %72 : vector<2x1x32xf32> to vector<2x32xf32>
    %cst_39 = arith.constant dense<0.000000e+00> : vector<2x32xf32>
    %74 = tpu.matmul %68, %0, %cst_39 {dimension_numbers = #tpu.dot_dimension_numbers<[1], [0], [0], [1], [0, 0, 1, 1], [], []>} : vector<2x32xf32>, vector<32x32xf32>, vector<2x32xf32> -> vector<2x32xf32>
    %75 = arith.addf %73, %74 : vector<2x32xf32>
    %cst_40 = arith.constant 0.899999976 : f32
    %76 = vector.broadcast %cst_40 : f32 to vector<2x32xf32>
    %77 = arith.mulf %76, %68 : vector<2x32xf32>
    %cst_41 = arith.constant 0.000000e+00 : f32
    %78 = vector.broadcast %cst_41 : f32 to vector<2x32xf32>
    %79 = arith.maximumf %75, %78 : vector<2x32xf32>
    %80 = arith.addf %77, %79 : vector<2x32xf32>
    %c0_42 = arith.constant 0 : index
    %c5 = arith.constant 5 : index
    %c0_43 = arith.constant 0 : index
    %81 = vector.load %arg7[%c0_42, %c5, %c0_43] : memref<2x8x32xf32, #tpu.memory_space<vmem>>, vector<2x1x32xf32>
    %82 = vector.shape_cast %81 : vector<2x1x32xf32> to vector<2x32xf32>
    %83 = vector.shape_cast %80 : vector<2x32xf32> to vector<2x1x32xf32>
    tpu.vector_store %arg7[%c0_42, %c5, %c0_43], %83 {strides = array<i32>} : memref<2x8x32xf32, #tpu.memory_space<vmem>>, vector<2x1x32xf32>,
    %84 = vector.extract_strided_slice %10 {offsets = [0, 6, 0], sizes = [2, 1, 32], strides = [1, 1, 1]} : vector<2x8x32xf32> to vector<2x1x32xf32>
    %85 = vector.shape_cast %84 : vector<2x1x32xf32> to vector<2x32xf32>
    %cst_44 = arith.constant dense<0.000000e+00> : vector<2x32xf32>
    %86 = tpu.matmul %80, %0, %cst_44 {dimension_numbers = #tpu.dot_dimension_numbers<[1], [0], [0], [1], [0, 0, 1, 1], [], []>} : vector<2x32xf32>, vector<32x32xf32>, vector<2x32xf32> -> vector<2x32xf32>
    %87 = arith.addf %85, %86 : vector<2x32xf32>
    %cst_45 = arith.constant 0.899999976 : f32
    %88 = vector.broadcast %cst_45 : f32 to vector<2x32xf32>
    %89 = arith.mulf %88, %80 : vector<2x32xf32>
    %cst_46 = arith.constant 0.000000e+00 : f32
    %90 = vector.broadcast %cst_46 : f32 to vector<2x32xf32>
    %91 = arith.maximumf %87, %90 : vector<2x32xf32>
    %92 = arith.addf %89, %91 : vector<2x32xf32>
    %c0_47 = arith.constant 0 : index
    %c6 = arith.constant 6 : index
    %c0_48 = arith.constant 0 : index
    %93 = vector.load %arg7[%c0_47, %c6, %c0_48] : memref<2x8x32xf32, #tpu.memory_space<vmem>>, vector<2x1x32xf32>
    %94 = vector.shape_cast %93 : vector<2x1x32xf32> to vector<2x32xf32>
    %95 = vector.shape_cast %92 : vector<2x32xf32> to vector<2x1x32xf32>
    tpu.vector_store %arg7[%c0_47, %c6, %c0_48], %95 {strides = array<i32>} : memref<2x8x32xf32, #tpu.memory_space<vmem>>, vector<2x1x32xf32>,
    %96 = vector.extract_strided_slice %10 {offsets = [0, 7, 0], sizes = [2, 1, 32], strides = [1, 1, 1]} : vector<2x8x32xf32> to vector<2x1x32xf32>
    %97 = vector.shape_cast %96 : vector<2x1x32xf32> to vector<2x32xf32>
    %cst_49 = arith.constant dense<0.000000e+00> : vector<2x32xf32>
    %98 = tpu.matmul %92, %0, %cst_49 {dimension_numbers = #tpu.dot_dimension_numbers<[1], [0], [0], [1], [0, 0, 1, 1], [], []>} : vector<2x32xf32>, vector<32x32xf32>, vector<2x32xf32> -> vector<2x32xf32>
    %99 = arith.addf %97, %98 : vector<2x32xf32>
    %cst_50 = arith.constant 0.899999976 : f32
    %100 = vector.broadcast %cst_50 : f32 to vector<2x32xf32>
    %101 = arith.mulf %100, %92 : vector<2x32xf32>
    %cst_51 = arith.constant 0.000000e+00 : f32
    %102 = vector.broadcast %cst_51 : f32 to vector<2x32xf32>
    %103 = arith.maximumf %99, %102 : vector<2x32xf32>
    %104 = arith.addf %101, %103 : vector<2x32xf32>
    %c0_52 = arith.constant 0 : index
    %c7 = arith.constant 7 : index
    %c0_53 = arith.constant 0 : index
    %105 = vector.load %arg7[%c0_52, %c7, %c0_53] : memref<2x8x32xf32, #tpu.memory_space<vmem>>, vector<2x1x32xf32>
    %106 = vector.shape_cast %105 : vector<2x1x32xf32> to vector<2x32xf32>
    %107 = vector.shape_cast %104 : vector<2x32xf32> to vector<2x1x32xf32>
    tpu.vector_store %arg7[%c0_52, %c7, %c0_53], %107 {strides = array<i32>} : memref<2x8x32xf32, #tpu.memory_space<vmem>>, vector<2x1x32xf32>,
    %c0_54 = arith.constant 0 : index
    %c0_55 = arith.constant 0 : index
    %c0_56 = arith.constant 0 : index
    %108 = vector.load %arg7[%c0_54, %c0_55, %c0_56] : memref<2x8x32xf32, #tpu.memory_space<vmem>>, vector<2x8x32xf32>
    %109 = vector.shape_cast %108 : vector<2x8x32xf32> to vector<16x32xf32>
    %cst_57 = arith.constant dense<0.000000e+00> : vector<16x2xf32>
    %110 = tpu.matmul %109, %1, %cst_57 {dimension_numbers = #tpu.dot_dimension_numbers<[1], [0], [0], [1], [0, 0, 1, 1], [], []>} : vector<16x32xf32>, vector<32x2xf32>, vector<16x2xf32> -> vector<16x2xf32>
    %111 = vector.broadcast %2 : vector<1x2xf32> to vector<16x2xf32>
    %112 = arith.addf %110, %111 : vector<16x2xf32>
    %113 = vector.shape_cast %112 : vector<16x2xf32> to vector<2x8x2xf32>
    %c0_58 = arith.constant 0 : index
    %c0_59 = arith.constant 0 : index
    %c0_60 = arith.constant 0 : index
    %114 = vector.load %arg6[%c0_58, %c0_59, %c0_60] : memref<2x8x2xf32, #tpu.memory_space<vmem>>, vector<2x8x2xf32>
    tpu.vector_store %arg6[%c0_58, %c0_59, %c0_60], %113 {strides = array<i32>} : memref<2x8x2xf32, #tpu.memory_space<vmem>>, vector<2x8x2xf32>,
    return
  }
}

</mosaic_0001>

<bundles_post_ra>
// kernel: tpu_custom_call.1
= control target key start
LH: loop header
LB: loop body
LE: loop exit
PB: predicated region body
PF: predicated region fallthrough
CT: control target
= control target key end

     0   :  { %11 = vsyncpa [#allocation4], 0  ;;  %s1454_s0 = inlined_call_operand.hbm [shape: f32[2,8,8], index: 0, kind: input, shape index: {}]   ;;  %s1455_s1 = inlined_call_operand.hbm [shape: f32[8,32], index: 1, kind: input, shape index: {}]   ;;  %s1456_s2 = inlined_call_operand.vmem [shape: f32[32,32], index: 2, kind: input, shape index: {}]   ;;  %s1457_s3 = inlined_call_operand.vmem [shape: f32[1,32], index: 3, kind: input, shape index: {}]   ;;  %s1458_s4 = inlined_call_operand.vmem [shape: f32[32,2], index: 4, kind: input, shape index: {}]   ;;  %s1459_s5 = inlined_call_operand.vmem [shape: f32[1,2], index: 5, kind: input, shape index: {}]   ;;  %s1460_s6 = inlined_call_operand.vmem [shape: f32[2,8,2], index: 6, kind: output, shape index: {}]  }
   0x1   :  { %12 = vsyncpa [#allocation6], 0  ;;  %s1230_s21 = smov [#allocation3]  }
   0x2   :  { %s18_s22 = sshll.u32 %s1230_s21, 4  ;;  %s19_s22 = int_to_ptr.vmem [resolvable:$true] %s18_s22 }
   0x3   :  { %s1194_s23 = scalar_lea.vmem %s19_s22, 256  ;;  %p1199_p1 = scmp.lt.s32.totalorder %s19_s22, %s19_s22 }
   0x4   :  { %p1195_p0 = scmp.ne.s32.totalorder %s19_s22, %s1194_s23  ;;  %p1200_p2 = scmp.lt.s32.totalorder %s1194_s23, %s1194_s23 }
   0x6   :  { %p1201_p3 = por %p1200_p2, %p1199_p1 }
   0x8   :  { %p1202_p4 = pnand %p1201_p3, %p1195_p0 }
   0xa   :  { %1205 = shalt.err (!%p1202_p4)
}
   0xb   :  { %s1231_s24 = smov 128   ;;  %s1232_s25 = smov 8  }
   0xc   :  { %24 = dma.hbm_to_vmem [thread:$0]  %s1454_s0, 256, %s19_s22, [#allocation4], %s1231_s24, %s1231_s24, %s1232_s25  }
   0xd   :  { %s1233_s28 = smov [#allocation5]  }
   0xe   :  { %s31_s29 = sshll.u32 %s1233_s28, 4  ;;  %s32_s29 = int_to_ptr.vmem [resolvable:$true] %s31_s29 }
   0xf   :  { %s1214_s30 = scalar_lea.vmem %s32_s29, 128  ;;  %p1219_p6 = scmp.lt.s32.totalorder %s32_s29, %s32_s29 }
  0x10   :  { %p1215_p5 = scmp.ne.s32.totalorder %s32_s29, %s1214_s30  ;;  %p1220_p7 = scmp.lt.s32.totalorder %s1214_s30, %s1214_s30 }
  0x12   :  { %p1221_p8 = por %p1220_p7, %p1219_p6 }
  0x14   :  { %p1222_p9 = pnand %p1221_p8, %p1215_p5 }
  0x16   :  { %1225 = shalt.err (!%p1222_p9)
}
  0x17   :  { %34 = dma.hbm_to_vmem [thread:$0]  %s1455_s1, 128, %s32_s29, [#allocation6]  }
  0x18   :  { %1226 = dma.done.wait [#allocation4], 256  }
  0x19   :  { %1227 = vsyncadd [#allocation4], 4294967040 }
  0x1a   :  { %1228 = dma.done.wait [#allocation6], 128  }
  0x1b   :  { %1229 = vsyncadd [#allocation6], 4294967168  ;;  %v1234_v0 = vmov 0.0   ;;  %vm1235_vm0 = vmmov 0   ;;  %v1283_v1 = vld [vmem:[%s1456_s2 + $0x18] sm:$0xff]  ;;  %v60_v2 = vld [vmem:[#allocation5] sm:$0xff] }
  0x1c   :  { %1081 = vmatprep.subr.mxu1 %v1234_v0  ;;  %1089 = vmatprep.mubr.msk.f32.mxu1 %vm1235_vm0, %v1234_v0  ;;  %v58_v3 = vld [vmem:[#allocation3] sm:$0xff]  ;;  %vm68_vm1 = vcmask 64512   ;;  %v59_v5 = vld [vmem:[#allocation3 + $0x8] sm:$0xff]  ;;  %v1295_v6 = vld [vmem:[%s1456_s2 + $0x8] sm:$0xff]  ;;  %vm234_vm2 = vcmask 253952   ;;  %vm240_vm3 = vcmask 1041409  }
  0x1d   :  { %1082 = vmatpush3.msra.mxu1 %v1283_v1  ;;  %1076 = vmatprep.subr.mxu0 %v60_v2  ;;  %v1289_v4 = vld [vmem:[%s1456_s2 + $0x10] sm:$0xff]  ;;  %v1302_v7 = vld [vmem:[%s1456_s2] sm:$0xff]  ;;  %vm150_vm4 = vcmask 261120   ;;  %vm1005_vm5 = vcmask 15360  }
  0x1e   :  { %1083 = vmatprep.subr.mxu1 %v1234_v0  ;;  %1077 = vmatpush3.msra.mxu0 %v60_v2  ;;  %v1014_v9 = vld [vmem:[%s1457_s3] ss:$0 sm:$0xff] }
  0x1f   :  { %1078 = vmatprep.mubr.msk.f32.mxu0 %vm68_vm1, %v58_v3  ;;  %1084 = vmatpush3.msra.mxu1 %v1289_v4 }
  0x20   :  { %1079 = vmatmul.mubr.msk.f32.vlgmr.msra.gmra.mxu0 %vm68_vm1, %v59_v5  ;;  %1085 = vmatprep.subr.mxu1 %v1234_v0 }
  0x21   :  { %1086 = vmatpush3.msra.mxu1 %v1295_v6  ;;  %1092 = vmatprep.subr.mxu0 %v1234_v0 }
  0x22   :  { %1087 = vmatprep.subr.mxu1 %v1234_v0  ;;  %1093 = vmatpush3.msra.mxu0 %v1283_v1 }
  0x23   :  { %1088 = vmatpush3.msra.mxu1 %v1302_v7  ;;  %1094 = vmatprep.subr.mxu0 %v1234_v0 }
  0x24   :  { %1090 = vmatmul.mubr.f32.vlgmr.msra.gmra.mxu1 %v1234_v0  ;;  %1095 = vmatpush3.msra.mxu0 %v1289_v4 }
  0x25   :  { %1096 = vmatprep.subr.mxu0 %v1234_v0  ;;  %1100 = vmatprep.mubr.msk.f32.mxu0 %vm1235_vm0, %v1234_v0 }
  0x26   :  { %1097 = vmatpush3.msra.mxu0 %v1295_v6  ;;  %1103 = vmatprep.subr.mxu1 %v1234_v0 }
  0x27   :  { %1098 = vmatprep.subr.mxu0 %v1234_v0  ;;  %1104 = vmatpush3.msra.mxu1 %v1283_v1 }
  0x28   :  { %1099 = vmatpush3.msra.mxu0 %v1302_v7  ;;  %1105 = vmatprep.subr.mxu1 %v1234_v0 }
  0x29   :  { %1106 = vmatpush3.msra.mxu1 %v1289_v4  ;;  %1111 = vmatprep.mubr.msk.f32.mxu1 %vm1235_vm0, %v1234_v0 }
  0x2a   :  { %1107 = vmatprep.subr.mxu1 %v1234_v0  ;;  %1114 = vmatprep.subr.mxu0 %v1234_v0 }
  0x2b   :  { %1108 = vmatpush3.msra.mxu1 %v1295_v6 }
  0x2c   :  { %1109 = vmatprep.subr.mxu1 %v1234_v0 }
  0x2d   :  { %1110 = vmatpush3.msra.mxu1 %v1302_v7 }
  0x2e   :  { %1125 = vmatprep.subr.mxu1 %v1234_v0 }
  0xe0   :  { %v1080_v8 = vpop.f32.mrf.mxu0 }
  0xe1   :  { %v1333_v11 = vadd.f32 %v1080_v8, %v1014_v9 }
  0xe2   :  { %v141_v10 = vpop.f32.mrf.mxu0 }
  0xe3   :  { %v1335_v12 = vadd.f32 %v1014_v9, %v141_v10 }
  0xe4   :  { %v220_v13 = vpop.f32.mrf.mxu1 }
  0xe5   :  { %v225_v14 = vrot.slane %v220_v13, 1  ;;  %v228_v15 = vadd.f32 %v220_v13, %v1335_v12 }
  0xe6   :  { %v1091_v16 = vpop.f32.mrf.mxu1 }
  0xe7   :  { %v229_v17 = vadd.f32 %v225_v14, %v1333_v11  ;;  %v230_v18 = vmax.f32 %v228_v15, 0.0 }
  0xe9   :  { %v231_v19 = vmax.f32 %v229_v17, 0.0  ;;  %235 = vst.msk [vmem:[#allocation2] sm:$0x1] %vm234_vm2, %v230_v18  ;;  %v320_v31 = vmul.f32 0.9, %v230_v18 }
  0xeb   :  { %236 = vst.msk [vmem:[#allocation2 + $0x8] sm:$0x1] %vm234_vm2, %v231_v19  ;;  %v239_v20 = vrot.slane %v231_v19, 7  ;;  %v321_v28 = vmul.f32 0.9, %v231_v19 }
  0xed   :  { %v241_v21 = vsel %vm240_vm3, %v239_v20, %v230_v18 }
  0xee   :  { %1101 = vmatmul.mubr.msk.f32.vlgmr.msra.gmra.mxu0 %vm150_vm4, %v241_v21 }
  0xef   :  { %1115 = vmatpush3.msra.mxu0 %v1283_v1  ;;  %1122 = vmatprep.mubr.msk.f32.mxu0 %vm1235_vm0, %v1234_v0 }
  0xf0   :  { %1116 = vmatprep.subr.mxu0 %v1234_v0 }
  0xf1   :  { %1117 = vmatpush3.msra.mxu0 %v1289_v4 }
  0xf2   :  { %1118 = vmatprep.subr.mxu0 %v1234_v0 }
  0xf3   :  { %1119 = vmatpush3.msra.mxu0 %v1295_v6 }
  0xf4   :  { %1120 = vmatprep.subr.mxu0 %v1234_v0 }
  0xf5   :  { %1121 = vmatpush3.msra.mxu0 %v1302_v7 }
  0xf6   :  { %1136 = vmatprep.subr.mxu0 %v1234_v0 }
 0x1ae   :  { %v310_v22 = vpop.f32.mrf.mxu0 }
 0x1af   :  { %v315_v23 = vrot.slane %v310_v22, 7  ;;  %v319_v24 = vadd.f32 %v310_v22, %v1333_v11 }
 0x1b0   :  { %v1102_v25 = vpop.f32.mrf.mxu0 }
 0x1b1   :  { %v318_v26 = vadd.f32 %v315_v23, %v1335_v12  ;;  %v323_v27 = vmax.f32 %v319_v24, 0.0 }
 0x1b3   :  { %v322_v29 = vmax.f32 %v318_v26, 0.0  ;;  %v327_v30 = vrot.slane %v323_v27, 1 }
 0x1b5   :  { %v326_v32 = vrot.slane %v322_v29, 1  ;;  %v331_v33 = vadd.f32 %v327_v30, %v321_v28 }
 0x1b7   :  { %v330_v34 = vadd.f32 %v326_v32, %v320_v31  ;;  %333 = vst.msk [vmem:[#allocation2 + $0x9] sm:$0x1] %vm234_vm2, %v331_v33  ;;  %v336_v35 = vrot.slane %v331_v33, 7  ;;  %v418_v46 = vmul.f32 0.9, %v331_v33 }
 0x1b9   :  { %332 = vst.msk [vmem:[#allocation2 + $0x1] sm:$0x1] %vm234_vm2, %v330_v34  ;;  %v337_v36 = vsel %vm240_vm3, %v336_v35, %v330_v34  ;;  %v417_v45 = vmul.f32 0.9, %v330_v34 }
 0x1ba   :  { %1112 = vmatmul.mubr.msk.f32.vlgmr.msra.gmra.mxu1 %vm150_vm4, %v337_v36 }
 0x1bb   :  { %1126 = vmatpush3.msra.mxu1 %v1283_v1  ;;  %1133 = vmatprep.mubr.msk.f32.mxu1 %vm1235_vm0, %v1234_v0 }
 0x1bc   :  { %1127 = vmatprep.subr.mxu1 %v1234_v0 }
 0x1bd   :  { %1128 = vmatpush3.msra.mxu1 %v1289_v4 }
 0x1be   :  { %1129 = vmatprep.subr.mxu1 %v1234_v0 }
 0x1bf   :  { %1130 = vmatpush3.msra.mxu1 %v1295_v6 }
 0x1c0   :  { %1131 = vmatprep.subr.mxu1 %v1234_v0 }
 0x1c1   :  { %1132 = vmatpush3.msra.mxu1 %v1302_v7 }
 0x1c2   :  { %1147 = vmatprep.subr.mxu1 %v1234_v0 }
 0x27a   :  { %v406_v37 = vpop.f32.mrf.mxu1 }
 0x27b   :  { %v411_v38 = vrot.slane %v406_v37, 6  ;;  %v412_v39 = vrot.slane %v406_v37, 7 }
 0x27c   :  { %v1113_v40 = vpop.f32.mrf.mxu1 }
 0x27d   :  { %v415_v41 = vadd.f32 %v411_v38, %v1335_v12  ;;  %v416_v42 = vadd.f32 %v412_v39, %v1333_v11 }
 0x27f   :  { %v419_v43 = vmax.f32 %v415_v41, 0.0  ;;  %v420_v44 = vmax.f32 %v416_v42, 0.0 }
 0x281   :  { %v423_v47 = vrot.slane %v419_v43, 2  ;;  %v424_v48 = vrot.slane %v420_v44, 2 }
 0x283   :  { %v427_v49 = vadd.f32 %v423_v47, %v417_v45  ;;  %v428_v50 = vadd.f32 %v424_v48, %v418_v46 }
 0x285   :  { %429 = vst.msk [vmem:[#allocation2 + $0x2] sm:$0x1] %vm234_vm2, %v427_v49  ;;  %430 = vst.msk [vmem:[#allocation2 + $0xa] sm:$0x1] %vm234_vm2, %v428_v50  ;;  %v433_v51 = vrot.slane %v428_v50, 7 }
 0x286   :  { %v514_v61 = vmul.f32 0.9, %v427_v49  ;;  %v515_v62 = vmul.f32 0.9, %v428_v50 }
 0x287   :  { %v434_v52 = vsel %vm240_vm3, %v433_v51, %v427_v49 }
 0x288   :  { %1123 = vmatmul.mubr.msk.f32.vlgmr.msra.gmra.mxu0 %vm150_vm4, %v434_v52 }
 0x289   :  { %1137 = vmatpush3.msra.mxu0 %v1283_v1  ;;  %1144 = vmatprep.mubr.msk.f32.mxu0 %vm1235_vm0, %v1234_v0 }
 0x28a   :  { %1138 = vmatprep.subr.mxu0 %v1234_v0 }
 0x28b   :  { %1139 = vmatpush3.msra.mxu0 %v1289_v4 }
 0x28c   :  { %1140 = vmatprep.subr.mxu0 %v1234_v0 }
 0x28d   :  { %1141 = vmatpush3.msra.mxu0 %v1295_v6 }
 0x28e   :  { %1142 = vmatprep.subr.mxu0 %v1234_v0 }
 0x28f   :  { %1143 = vmatpush3.msra.mxu0 %v1302_v7 }
 0x290   :  { %1158 = vmatprep.subr.mxu0 %v1234_v0 }
 0x348   :  { %v503_v53 = vpop.f32.mrf.mxu0 }
 0x349   :  { %v508_v54 = vrot.slane %v503_v53, 5  ;;  %v509_v55 = vrot.slane %v503_v53, 6 }
 0x34a   :  { %v1124_v56 = vpop.f32.mrf.mxu0 }
 0x34b   :  { %v512_v57 = vadd.f32 %v508_v54, %v1335_v12  ;;  %v513_v58 = vadd.f32 %v509_v55, %v1333_v11  ;;  %v56_v55 = vld [vmem:[%s1458_s4 + $0x18] sm:$0xff]  ;;  %v55_v56 = vld [vmem:[%s1458_s4 + $0x10] sm:$0xff] }
 0x34d   :  { %v516_v59 = vmax.f32 %v512_v57, 0.0  ;;  %v517_v60 = vmax.f32 %v513_v58, 0.0  ;;  %v54_v57 = vld [vmem:[%s1458_s4 + $0x8] sm:$0xff]  ;;  %v53_v58 = vld [vmem:[%s1458_s4] sm:$0xff] }
 0x34f   :  { %v520_v63 = vrot.slane %v516_v59, 3  ;;  %v521_v2 = vrot.slane %v517_v60, 3 }
 0x351   :  { %v524_v3 = vadd.f32 %v520_v63, %v514_v61  ;;  %v525_v5 = vadd.f32 %v521_v2, %v515_v62 }
 0x353   :  { %526 = vst.msk [vmem:[#allocation2 + $0x3] sm:$0x1] %vm234_vm2, %v524_v3  ;;  %527 = vst.msk [vmem:[#allocation2 + $0xb] sm:$0x1] %vm234_vm2, %v525_v5  ;;  %v530_v8 = vrot.slane %v525_v5, 7 }
 0x354   :  { %v611_v20 = vmul.f32 0.9, %v524_v3  ;;  %v612_v21 = vmul.f32 0.9, %v525_v5 }
 0x355   :  { %v531_v9 = vsel %vm240_vm3, %v530_v8, %v524_v3 }
 0x356   :  { %1134 = vmatmul.mubr.msk.f32.vlgmr.msra.gmra.mxu1 %vm150_vm4, %v531_v9 }
 0x357   :  { %1148 = vmatpush3.msra.mxu1 %v1283_v1  ;;  %1155 = vmatprep.mubr.msk.f32.mxu1 %vm1235_vm0, %v1234_v0 }
 0x358   :  { %1149 = vmatprep.subr.mxu1 %v1234_v0 }
 0x359   :  { %1150 = vmatpush3.msra.mxu1 %v1289_v4 }
 0x35a   :  { %1151 = vmatprep.subr.mxu1 %v1234_v0 }
 0x35b   :  { %1152 = vmatpush3.msra.mxu1 %v1295_v6 }
 0x35c   :  { %1153 = vmatprep.subr.mxu1 %v1234_v0 }
 0x35d   :  { %1154 = vmatpush3.msra.mxu1 %v1302_v7 }
 0x35e   :  { %1169 = vmatprep.subr.mxu1 %v56_v55 }
 0x416   :  { %v600_v10 = vpop.f32.mrf.mxu1 }
 0x417   :  { %v605_v13 = vrot.slane %v600_v10, 4  ;;  %v606_v14 = vrot.slane %v600_v10, 5 }
 0x418   :  { %v1135_v15 = vpop.f32.mrf.mxu1 }
 0x419   :  { %v609_v16 = vadd.f32 %v605_v13, %v1335_v12  ;;  %v610_v17 = vadd.f32 %v606_v14, %v1333_v11 }
 0x41b   :  { %v613_v18 = vmax.f32 %v609_v16, 0.0  ;;  %v614_v19 = vmax.f32 %v610_v17, 0.0 }
 0x41d   :  { %v617_v22 = vrot.slane %v613_v18, 4  ;;  %v618_v23 = vrot.slane %v614_v19, 4 }
 0x41f   :  { %v621_v24 = vadd.f32 %v617_v22, %v611_v20  ;;  %v622_v25 = vadd.f32 %v618_v23, %v612_v21 }
 0x421   :  { %623 = vst.msk [vmem:[#allocation2 + $0x4] sm:$0x1] %vm234_vm2, %v621_v24  ;;  %624 = vst.msk [vmem:[#allocation2 + $0xc] sm:$0x1] %vm234_vm2, %v622_v25  ;;  %v627_v26 = vrot.slane %v622_v25, 7 }
 0x422   :  { %v708_v35 = vmul.f32 0.9, %v621_v24 }
 0x423   :  { %v628_v27 = vsel %vm240_vm3, %v627_v26, %v621_v24 }
 0x424   :  { %1145 = vmatmul.mubr.msk.f32.vlgmr.msra.gmra.mxu0 %vm150_vm4, %v628_v27 }
 0x425   :  { %1159 = vmatpush3.msra.mxu0 %v1283_v1  ;;  %1166 = vmatprep.mubr.msk.f32.mxu0 %vm1235_vm0, %v1234_v0 }
 0x426   :  { %1160 = vmatprep.subr.mxu0 %v1234_v0 }
 0x427   :  { %1161 = vmatpush3.msra.mxu0 %v1289_v4  ;;  %v709_v4 = vmul.f32 0.9, %v622_v25 }
 0x428   :  { %1162 = vmatprep.subr.mxu0 %v1234_v0 }
 0x429   :  { %1163 = vmatpush3.msra.mxu0 %v1295_v6 }
 0x42a   :  { %1164 = vmatprep.subr.mxu0 %v1234_v0 }
 0x42b   :  { %1165 = vmatpush3.msra.mxu0 %v1302_v7 }
 0x4e4   :  { %v697_v28 = vpop.f32.mrf.mxu0 }
 0x4e5   :  { %v702_v29 = vrot.slane %v697_v28, 3  ;;  %v703_v30 = vrot.slane %v697_v28, 4 }
 0x4e6   :  { %v1146_v31 = vpop.f32.mrf.mxu0 }
 0x4e7   :  { %v706_v1 = vadd.f32 %v702_v29, %v1335_v12  ;;  %v707_v32 = vadd.f32 %v703_v30, %v1333_v11 }
 0x4e9   :  { %v710_v33 = vmax.f32 %v706_v1, 0.0  ;;  %v711_v34 = vmax.f32 %v707_v32, 0.0 }
 0x4eb   :  { %v714_v36 = vrot.slane %v710_v33, 5  ;;  %v715_v37 = vrot.slane %v711_v34, 5 }
 0x4ed   :  { %v718_v38 = vadd.f32 %v714_v36, %v708_v35  ;;  %v719_v6 = vadd.f32 %v715_v37, %v709_v4 }
 0x4ef   :  { %720 = vst.msk [vmem:[#allocation2 + $0x5] sm:$0x1] %vm234_vm2, %v718_v38  ;;  %721 = vst.msk [vmem:[#allocation2 + $0xd] sm:$0x1] %vm234_vm2, %v719_v6  ;;  %v724_v0 = vrot.slane %v719_v6, 7 }
 0x4f0   :  { %v805_v47 = vmul.f32 0.9, %v718_v38  ;;  %v806_v48 = vmul.f32 0.9, %v719_v6 }
 0x4f1   :  { %v725_v7 = vsel %vm240_vm3, %v724_v0, %v718_v38 }
 0x4f2   :  { %1156 = vmatmul.mubr.msk.f32.vlgmr.msra.gmra.mxu1 %vm150_vm4, %v725_v7 }
 0x4f3   :  { %1170 = vmatpush3.msra.mxu1 %v56_v55 }
 0x4f4   :  { %1171 = vmatprep.subr.mxu1 %v55_v56 }
 0x4f5   :  { %1172 = vmatpush3.msra.mxu1 %v55_v56 }
 0x4f6   :  { %1173 = vmatprep.subr.mxu1 %v54_v57 }
 0x4f7   :  { %1174 = vmatpush3.msra.mxu1 %v54_v57 }
 0x4f8   :  { %1175 = vmatprep.subr.mxu1 %v53_v58 }
 0x4f9   :  { %1176 = vmatpush3.msra.mxu1 %v53_v58 }
 0x5b2   :  { %v794_v39 = vpop.f32.mrf.mxu1 }
 0x5b3   :  { %v799_v40 = vrot.slane %v794_v39, 2  ;;  %v800_v41 = vrot.slane %v794_v39, 3 }
 0x5b4   :  { %v1157_v42 = vpop.f32.mrf.mxu1 }
 0x5b5   :  { %v803_v43 = vadd.f32 %v799_v40, %v1335_v12  ;;  %v804_v44 = vadd.f32 %v800_v41, %v1333_v11 }
 0x5b7   :  { %v807_v45 = vmax.f32 %v803_v43, 0.0  ;;  %v808_v46 = vmax.f32 %v804_v44, 0.0 }
 0x5b9   :  { %v811_v49 = vrot.slane %v807_v45, 6  ;;  %v812_v50 = vrot.slane %v808_v46, 6 }
 0x5bb   :  { %v815_v51 = vadd.f32 %v811_v49, %v805_v47  ;;  %v816_v52 = vadd.f32 %v812_v50, %v806_v48 }
 0x5bd   :  { %817 = vst.msk [vmem:[#allocation2 + $0x6] sm:$0x1] %vm234_vm2, %v815_v51  ;;  %818 = vst.msk [vmem:[#allocation2 + $0xe] sm:$0x1] %vm234_vm2, %v816_v52  ;;  %v821_v53 = vrot.slane %v816_v52, 7 }
 0x5be   :  { %v902_v8 = vmul.f32 0.9, %v815_v51  ;;  %v903_v9 = vmul.f32 0.9, %v816_v52 }
 0x5bf   :  { %v822_v54 = vsel %vm240_vm3, %v821_v53, %v815_v51 }
 0x5c0   :  { %1167 = vmatmul.mubr.msk.f32.vlgmr.msra.gmra.mxu0 %vm150_vm4, %v822_v54 }
 0x680   :  { %v891_v59 = vpop.f32.mrf.mxu0 }
 0x681   :  { %v896_v60 = vrot.slane %v891_v59, 1  ;;  %v897_v61 = vrot.slane %v891_v59, 2 }
 0x682   :  { %v1168_v62 = vpop.f32.mrf.mxu0 }
 0x683   :  { %v900_v63 = vadd.f32 %v896_v60, %v1335_v12  ;;  %v901_v2 = vadd.f32 %v897_v61, %v1333_v11  ;;  %v1024_v11 = vld [vmem:[%s1459_s5] ss:$0 sm:$0xff] }
 0x685   :  { %v904_v3 = vmax.f32 %v900_v63, 0.0  ;;  %v905_v5 = vmax.f32 %v901_v2, 0.0 }
 0x687   :  { %v908_v10 = vrot.slane %v904_v3, 7  ;;  %v909_v13 = vrot.slane %v905_v5, 7 }
 0x689   :  { %v912_v14 = vadd.f32 %v908_v10, %v902_v8  ;;  %v913_v15 = vadd.f32 %v909_v13, %v903_v9 }
 0x68b   :  { %914 = vst.msk [vmem:[#allocation2 + $0x7] sm:$0x1] %vm234_vm2, %v912_v14  ;;  %915 = vst.msk [vmem:[#allocation2 + $0xf] sm:$0x1] %vm234_vm2, %v913_v15 }
 0x692   :  { %v916_v16 = vld [vmem:[#allocation2] sm:$0xff]  ;;  %v917_v17 = vld [vmem:[#allocation2 + $0x8] sm:$0xff] }
 0x693   :  { %1177 = vmatprep.mubr.msk.f32.mxu1 %vm150_vm4, %v916_v16 }
 0x694   :  { %1178 = vmatmul.mubr.msk.f32.vlgmr.msra.gmra.mxu1 %vm150_vm4, %v917_v17 }
 0x754   :  { %v1179_v12 = vpop.f32.mrf.mxu1 }
 0x755   :  { %v1002_v18 = vadd.f32 %v1179_v12, %v1024_v11 }
 0x756   :  { %v996_v19 = vpop.f32.mrf.mxu1 }
 0x757   :  { %1007 = vst.msk [vmem:[%s1460_s6 + $0x8] sm:$0xff] %vm1005_vm5, %v1002_v18  ;;  %v997_v20 = vadd.f32 %v1024_v11, %v996_v19 }
 0x759   :  { %1006 = vst.msk [vmem:[%s1460_s6] sm:$0xff] %vm1005_vm5, %v997_v20 }
 0x75a   :  { %1012 = vsyncpa [#allocation4], 1 }
 0x75b   :  { %1013 = vsyncpa [#allocation6], 1 }

</bundles_post_ra>
